<compile_context>
chip_gen: v6e
topology: v6e:2x2x1
jax: 0.10.0
libtpu: 0.0.40
codegen_flags: <defaults>
</compile_context>

<pallas_src>
import jax
import jax.numpy as jnp
from jax import lax
from jax.experimental import pallas as pl
from jax.experimental.pallas import tpu as pltpu


def _round_up(n, m):
    return ((n + m - 1) // m) * m


# --------------------------------------------------------------------------- #
# Kernel 1: head-major Q/K/V projection.  grid = (B, H).
# --------------------------------------------------------------------------- #
def _qkv_proj_kernel(x_ref, wq_ref, wk_ref, wv_ref, bq_ref, bk_ref, bv_ref,
                     q_out, k_out, v_out):
    x = x_ref[0]                                                    # (Sp, E)
    q = jnp.dot(x, wq_ref[0], preferred_element_type=jnp.float32) + bq_ref[0]
    k = jnp.dot(x, wk_ref[0], preferred_element_type=jnp.float32) + bk_ref[0]
    v = jnp.dot(x, wv_ref[0], preferred_element_type=jnp.float32) + bv_ref[0]
    q_out[0, 0] = q.astype(q_out.dtype)
    k_out[0, 0] = k.astype(k_out.dtype)
    v_out[0, 0] = v.astype(v_out.dtype)


# --------------------------------------------------------------------------- #
# Kernel 2: all-heads attention + output projection.  grid = (B, Sp // TQ).
# --------------------------------------------------------------------------- #
def _make_attn_kernel(num_heads, scale, seq_len, seq_pad, emit_attn):
    def kernel(q_ref, k_ref, v_ref, wo_ref, bo_ref, *out_refs):
        if emit_attn:
            out_ref, attn_w_ref = out_refs
        else:
            (out_ref,) = out_refs
        cdt = q_ref.dtype                    # activation (torch Linear) dtype

        qh = q_ref[0]                                               # (H, TQ, Dp)
        kh = k_ref[0]                                               # (H, Sp, Dp)
        vh = v_ref[0]                                               # (H, Sp, Dp)

        scores = jnp.einsum('hqd,hkd->hqk', qh, kh,
                            preferred_element_type=jnp.float32) * scale
        if seq_pad > seq_len:                # mask padded key positions
            kidx = lax.broadcasted_iota(jnp.int32, (1, seq_pad), 1)
            scores = jnp.where(kidx < seq_len, scores, jnp.float32(-1e30))

        m = jnp.max(scores, axis=-1, keepdims=True)
        e = jnp.exp(scores - m)
        l = jnp.sum(e, axis=-1, keepdims=True)
        # exact reciprocal when attn weights are emitted (tight tolerance),
        # EUP-approx (otherwise-idle slot) on the fast path.
        probs = e * pl.reciprocal(l, approx=not emit_attn)

        if emit_attn:
            attn_w_ref[0] = probs.astype(attn_w_ref.dtype)

        # dropout p = 0.0 (attention_droupout default) -> identity; omitted.
        ctx = jnp.einsum('hqk,hkd->hqd', probs.astype(cdt), vh,
                         preferred_element_type=jnp.float32)        # (H, TQ, Dp)

        acc = None                           # per-head output projection, f32 acc
        for h in range(num_heads):
            part = jnp.dot(ctx[h].astype(cdt), wo_ref[h],
                           preferred_element_type=jnp.float32)      # (TQ, E)
            acc = part if acc is None else acc + part
        out_ref[0] = (acc + bo_ref[...]).astype(out_ref.dtype)

    return kernel


def siglip_attention(hidden_states, params, *, num_heads,
                     return_attn_weights=True, q_tile=None):
    """hidden_states: (B, S, E). params: torch-style wq/wk/wv/wo (out,in)=(E,E), b* (E,).
    Returns (attn_output (B, S, E), attn_weights (B, H, S, S) or None)."""
    B, S, E = hidden_states.shape
    H = num_heads
    assert E % H == 0, "embed_dim must be divisible by num_heads"
    D = E // H
    Dp = _round_up(D, 128)                   # lane-dense head dim (zero-padded)
    scale = D ** -0.5
    dtype = hidden_states.dtype
    itemsize = jnp.dtype(dtype).itemsize

    # ---- per-generation VMEM capacity / tile cap --------------------------- #
    try:
        vmem_cap = int(getattr(pltpu.get_tpu_info(), "vmem_capacity_bytes",
                               64 * 1024 * 1024))
    except Exception:
        vmem_cap = 64 * 1024 * 1024
    headroom = 2 * 1024 * 1024
    max_tile = 128 if vmem_cap <= 80 * 1024 * 1024 else 256     # v7x vs v5e/v6e

    # ---- sequence padding + query tile -------------------------------------- #
    if q_tile is not None:
        TQ = _round_up(q_tile, 8)
        Sp = _round_up(S, TQ)
    elif S <= max_tile:
        TQ = _round_up(S, 8)
        Sp = TQ
    else:
        Sp = _round_up(S, 128)               # e.g. SigLIP S=729 -> 768 (lane-dense)
        TQ = max_tile if Sp % max_tile == 0 else 128
    n_q = Sp // TQ

    x_p = hidden_states if Sp == S else jnp.pad(
        hidden_states, ((0, 0), (0, Sp - S), (0, 0)))

    # ---- host-side weight relayout (kills in-kernel reshapes/transposes) ---- #
    def w_in_head(w):                        # torch (E_out, E_in) -> (H, E, Dp)
        w = jnp.asarray(w).reshape(H, D, E).transpose(0, 2, 1)
        if Dp != D:
            w = jnp.pad(w, ((0, 0), (0, 0), (0, Dp - D)))
        return w.astype(dtype)

    def b_in_head(b):                        # (E,) -> (H, 1, Dp), f32
        b = jnp.asarray(b).reshape(H, 1, D).astype(jnp.float32)
        if Dp != D:
            b = jnp.pad(b, ((0, 0), (0, 0), (0, Dp - D)))
        return b

    wq, wk, wv = (w_in_head(params[k]) for k in ("wq", "wk", "wv"))
    bq, bk, bv = (b_in_head(params[k]) for k in ("bq", "bk", "bv"))
    wo = jnp.asarray(params["wo"]).T.reshape(H, D, E)           # (H, D, E)
    if Dp != D:
        wo = jnp.pad(wo, ((0, 0), (0, Dp - D), (0, 0)))
    wo = wo.astype(dtype)
    bo = jnp.asarray(params["bo"]).reshape(1, E).astype(jnp.float32)

    Ep = _round_up(E, 128)
    Spl = _round_up(Sp, 128)

    # ========================= kernel 1: Q/K/V projection ===================== #
    qkv_shape = jax.ShapeDtypeStruct((B, H, Sp, Dp), dtype)
    qkv_spec = pl.BlockSpec((1, 1, Sp, Dp), lambda b, h: (b, h, 0, 0))
    w_spec = pl.BlockSpec((1, E, Dp), lambda b, h: (h, 0, 0))
    b_spec = pl.BlockSpec((1, 1, Dp), lambda b, h: (h, 0, 0))

    proj_need = (2 * Sp * Ep * itemsize
                 + 3 * 2 * (E * Dp * itemsize + 8 * Dp * 4 + Sp * Dp * itemsize)
                 + 3 * Sp * Dp * 4)
    proj_vmem = int(min(max(int(proj_need * 1.3), 32 * 1024 * 1024),
                        vmem_cap - headroom))

    q_hm, k_hm, v_hm = pl.pallas_call(
        _qkv_proj_kernel,
        out_shape=(qkv_shape, qkv_shape, qkv_shape),
        grid_spec=pltpu.PrefetchScalarGridSpec(
            num_scalar_prefetch=0,
            grid=(B, H),
            in_specs=[pl.BlockSpec((1, Sp, E), lambda b, h: (b, 0, 0)),
                      w_spec, w_spec, w_spec, b_spec, b_spec, b_spec],
            out_specs=(qkv_spec, qkv_spec, qkv_spec)),
        compiler_params=pltpu.CompilerParams(
            dimension_semantics=("parallel", "parallel"),
            vmem_limit_bytes=proj_vmem),
        cost_estimate=pl.CostEstimate(
            flops=int(6 * B * Sp * E * H * Dp),
            transcendentals=0,
            bytes_accessed=int((B * Sp * E + 3 * H * E * Dp
                                + 3 * B * H * Sp * Dp) * itemsize)),
    )(x_p, wq, wk, wv, bq, bk, bv)

    # ============================ kernel 2: attention ========================== #
    kernel = _make_attn_kernel(H, scale, S, Sp, return_attn_weights)

    q_spec = pl.BlockSpec((1, H, TQ, Dp), lambda b, qi: (b, 0, qi, 0))
    # K/V blocks are resident across the q-tile axis; at B=1 there is nothing to
    # prefetch, so a single buffer halves their VMEM footprint for free.
    if B == 1:
        kv_spec = pl.BlockSpec((1, H, Sp, Dp), lambda b, qi: (b, 0, 0, 0),
                               pipeline_mode=pl.Buffered(1))
    else:
        kv_spec = pl.BlockSpec((1, H, Sp, Dp), lambda b, qi: (b, 0, 0, 0))
    # Grid-constant weights/bias: never re-fetched, so single-buffer them.
    wo_spec = pl.BlockSpec((H, Dp, E), lambda b, qi: (0, 0, 0),
                           pipeline_mode=pl.Buffered(1))
    bo_spec = pl.BlockSpec((1, E), lambda b, qi: (0, 0),
                           pipeline_mode=pl.Buffered(1))

    out_shapes = [jax.ShapeDtypeStruct((B, Sp, E), dtype)]
    out_specs = [pl.BlockSpec((1, TQ, E), lambda b, qi: (b, qi, 0))]
    if return_attn_weights:
        out_shapes.append(jax.ShapeDtypeStruct((B, H, Sp, Sp), dtype))
        out_specs.append(pl.BlockSpec((1, H, TQ, Sp), lambda b, qi: (b, 0, qi, 0)))

    kv_bufs = 1 if B == 1 else 2
    attn_need = (2 * H * TQ * Dp * itemsize                    # q block
                 + 2 * kv_bufs * H * Sp * Dp * itemsize        # k + v blocks
                 + H * Dp * Ep * itemsize                      # wo (single buffer)
                 + 2 * TQ * Ep * itemsize                      # out block
                 + 4 * H * TQ * Spl * 4                        # f32 scores/e/probs
                 + H * TQ * Dp * 4 + TQ * Ep * 4)              # ctx / out accumulator
    if return_attn_weights:
        attn_need += 2 * H * TQ * Spl * itemsize
    attn_vmem = int(min(max(int(attn_need * 1.25), 32 * 1024 * 1024),
                        vmem_cap - headroom))

    attn_flops = 4 * B * H * Sp * Sp * Dp + 2 * B * Sp * H * Dp * E
    attn_bytes = (3 * B * H * Sp * Dp + H * Dp * E + 2 * B * Sp * E) * itemsize
    if return_attn_weights:
        attn_bytes += B * H * Sp * Sp * itemsize

    results = pl.pallas_call(
        kernel,
        out_shape=tuple(out_shapes),
        grid_spec=pltpu.PrefetchScalarGridSpec(
            num_scalar_prefetch=0,
            grid=(B, n_q),
            in_specs=[q_spec, kv_spec, kv_spec, wo_spec, bo_spec],
            out_specs=tuple(out_specs)),
        compiler_params=pltpu.CompilerParams(
            dimension_semantics=("parallel", "parallel"),
            vmem_limit_bytes=attn_vmem),
        cost_estimate=pl.CostEstimate(
            flops=int(attn_flops),
            transcendentals=int(B * H * Sp * Sp),
            bytes_accessed=int(attn_bytes)),
    )(q_hm, k_hm, v_hm, wo, bo)

    out = results[0]
    if Sp != S:
        out = out[:, :S, :]
    if return_attn_weights:
        attn_w = results[1]
        if Sp != S:
            attn_w = attn_w[:, :, :S, :S]
        return out, attn_w
    return out, None


def siglip_attention_ref(hidden_states, params, *, num_heads):
    """Pure-JAX reference mirroring the PyTorch forward."""
    B, S, E = hidden_states.shape
    D = E // num_heads
    scale = D ** -0.5

    def lin(x, w, b):  # torch nn.Linear: x @ W^T + b
        return jnp.einsum("bse,oe->bso", x, w) + b

    q = lin(hidden_states, params["wq"], params["bq"])
    k = lin(hidden_states, params["wk"], params["bk"])
    v = lin(hidden_states, params["wv"], params["bv"])
    q = q.reshape(B, S, num_heads, D).transpose(0, 2, 1, 3)
    k = k.reshape(B, S, num_heads, D).transpose(0, 2, 1, 3)
    v = v.reshape(B, S, num_heads, D).transpose(0, 2, 1, 3)
    w = jnp.einsum("bhqd,bhkd->bhqk", q, k) * scale
    w = jax.nn.softmax(w.astype(jnp.float32), axis=-1).astype(q.dtype)
    o = jnp.einsum("bhqk,bhkd->bhqd", w, v)
    o = o.transpose(0, 2, 1, 3).reshape(B, S, E)
    o = jnp.einsum("bse,oe->bso", o, params["wo"]) + params["bo"]
    return o, w


if __name__ == "__main__":
    # Small shapes consistent with the module: B=2, S=8, hidden=32, heads=4 (D=8)
    B, S, E, H = 2, 8, 32, 4
    key = jax.random.PRNGKey(0)
    ks = jax.random.split(key, 11)

    x = jax.random.normal(ks[0], (B, S, E), dtype=jnp.float32)
    params = {
        "wq": jax.random.normal(ks[1], (E, E), dtype=jnp.float32) * (E ** -0.5),
        "wk": jax.random.normal(ks[2], (E, E), dtype=jnp.float32) * (E ** -0.5),
        "wv": jax.random.normal(ks[3], (E, E), dtype=jnp.float32) * (E ** -0.5),
        "wo": jax.random.normal(ks[4], (E, E), dtype=jnp.float32) * (E ** -0.5),
        "bq": jax.random.normal(ks[5], (E,), dtype=jnp.float32) * 0.02,
        "bk": jax.random.normal(ks[6], (E,), dtype=jnp.float32) * 0.02,
        "bv": jax.random.normal(ks[7], (E,), dtype=jnp.float32) * 0.02,
        "bo": jax.random.normal(ks[8], (E,), dtype=jnp.float32) * 0.02,
    }

    ref_out, ref_w = siglip_attention_ref(x, params, num_heads=H)

    # Full forward (matches the PyTorch module's (output, attn_weights) return).
    out, attn_w = siglip_attention(x, params, num_heads=H)
    out = jax.block_until_ready(out)
    attn_w = jax.block_until_ready(attn_w)
    assert out.shape == (B, S, E) and attn_w.shape == (B, H, S, S)
    assert jnp.allclose(out, ref_out, atol=1e-4, rtol=1e-4)
    assert jnp.allclose(attn_w, ref_w, atol=1e-5, rtol=1e-5)

    # Fast path: skip the dominant (B,H,S,S) attention-weights HBM write
    # (uses the EUP-approx reciprocal, hence the looser tolerance).
    out2, attn2 = siglip_attention(x, params, num_heads=H, return_attn_weights=False)
    out2 = jax.block_until_ready(out2)
    assert attn2 is None
    assert jnp.allclose(out2, ref_out, atol=5e-3, rtol=5e-3)

    # Query tiling (S=16 split into two q-tiles of 8) + resident K/V reuse.
    x3 = jax.random.normal(ks[9], (1, 16, E), dtype=jnp.float32)
    ref3_out, ref3_w = siglip_attention_ref(x3, params, num_heads=H)
    out3, w3 = siglip_attention(x3, params, num_heads=H, q_tile=8)
    out3 = jax.block_until_ready(out3)
    w3 = jax.block_until_ready(w3)
    assert jnp.allclose(out3, ref3_out, atol=1e-4, rtol=1e-4)
    assert jnp.allclose(w3, ref3_w, atol=1e-5, rtol=1e-5)

    # Sequence padding + key-mask path (S=12 pads to 16, sliced back afterwards).
    x4 = jax.random.normal(ks[10], (1, 12, E), dtype=jnp.float32)
    ref4_out, ref4_w = siglip_attention_ref(x4, params, num_heads=H)
    out4, w4 = siglip_attention(x4, params, num_heads=H)
    out4 = jax.block_until_ready(out4)
    w4 = jax.block_until_ready(w4)
    assert out4.shape == (1, 12, E) and w4.shape == (1, H, 12, 12)
    assert jnp.allclose(out4, ref4_out, atol=1e-4, rtol=1e-4)
    assert jnp.allclose(w4, ref4_w, atol=1e-5, rtol=1e-5)

    print("KERNEL_OK")
</pallas_src>

<mosaic_0001>
module attributes {stable_mosaic.version = 11 : i64} {
  func.func @_qkv_proj_kernel(%arg0: i32, %arg1: i32, %arg2: memref<1x8x32xf32, #tpu.memory_space<vmem>>, %arg3: memref<1x32x128xf32, #tpu.memory_space<vmem>>, %arg4: memref<1x32x128xf32, #tpu.memory_space<vmem>>, %arg5: memref<1x32x128xf32, #tpu.memory_space<vmem>>, %arg6: memref<1x1x128xf32, #tpu.memory_space<vmem>>, %arg7: memref<1x1x128xf32, #tpu.memory_space<vmem>>, %arg8: memref<1x1x128xf32, #tpu.memory_space<vmem>>, %arg9: memref<1x1x8x128xf32, #tpu.memory_space<vmem>>, %arg10: memref<1x1x8x128xf32, #tpu.memory_space<vmem>>, %arg11: memref<1x1x8x128xf32, #tpu.memory_space<vmem>>) attributes {dimension_semantics = [#tpu.dimension_semantics<parallel>, #tpu.dimension_semantics<parallel>], iteration_bounds = array<i64: 2, 4>, scalar_prefetch = 0 : i64, scratch_operands = 0 : i64, tpu.core_type = #tpu.core_type<tc>, window_params = [{transform_indices = @transform_0, window_bounds = array<i64: 1, 8, 32>}, {transform_indices = @transform_1, window_bounds = array<i64: 1, 32, 128>}, {transform_indices = @transform_2, window_bounds = array<i64: 1, 32, 128>}, {transform_indices = @transform_3, window_bounds = array<i64: 1, 32, 128>}, {transform_indices = @transform_4, window_bounds = array<i64: 1, 1, 128>}, {transform_indices = @transform_5, window_bounds = array<i64: 1, 1, 128>}, {transform_indices = @transform_6, window_bounds = array<i64: 1, 1, 128>}, {transform_indices = @transform_7, window_bounds = array<i64: 1, 1, 8, 128>}, {transform_indices = @transform_8, window_bounds = array<i64: 1, 1, 8, 128>}, {transform_indices = @transform_9, window_bounds = array<i64: 1, 1, 8, 128>}]} {
    %c0 = arith.constant 0 : index
    %c0_0 = arith.constant 0 : index
    %c0_1 = arith.constant 0 : index
    %0 = vector.load %arg2[%c0, %c0_0, %c0_1] : memref<1x8x32xf32, #tpu.memory_space<vmem>>, vector<1x8x32xf32>
    %1 = vector.shape_cast %0 : vector<1x8x32xf32> to vector<8x32xf32>
    %c0_2 = arith.constant 0 : index
    %c0_3 = arith.constant 0 : index
    %c0_4 = arith.constant 0 : index
    %2 = vector.load %arg3[%c0_2, %c0_3, %c0_4] : memref<1x32x128xf32, #tpu.memory_space<vmem>>, vector<1x32x128xf32>
    %3 = vector.shape_cast %2 : vector<1x32x128xf32> to vector<32x128xf32>
    %cst = arith.constant dense<0.000000e+00> : vector<8x128xf32>
    %4 = tpu.matmul %1, %3, %cst {dimension_numbers = #tpu.dot_dimension_numbers<[1], [0], [0], [1], [0, 0, 1, 1], [], []>} : vector<8x32xf32>, vector<32x128xf32>, vector<8x128xf32> -> vector<8x128xf32>
    %c0_5 = arith.constant 0 : index
    %c0_6 = arith.constant 0 : index
    %c0_7 = arith.constant 0 : index
    %5 = vector.load %arg6[%c0_5, %c0_6, %c0_7] : memref<1x1x128xf32, #tpu.memory_space<vmem>>, vector<1x1x128xf32>
    %6 = vector.shape_cast %5 : vector<1x1x128xf32> to vector<1x128xf32>
    %7 = vector.broadcast %6 : vector<1x128xf32> to vector<8x128xf32>
    %8 = arith.addf %4, %7 : vector<8x128xf32>
    %c0_8 = arith.constant 0 : index
    %c0_9 = arith.constant 0 : index
    %c0_10 = arith.constant 0 : index
    %9 = vector.load %arg4[%c0_8, %c0_9, %c0_10] : memref<1x32x128xf32, #tpu.memory_space<vmem>>, vector<1x32x128xf32>
    %10 = vector.shape_cast %9 : vector<1x32x128xf32> to vector<32x128xf32>
    %cst_11 = arith.constant dense<0.000000e+00> : vector<8x128xf32>
    %11 = tpu.matmul %1, %10, %cst_11 {dimension_numbers = #tpu.dot_dimension_numbers<[1], [0], [0], [1], [0, 0, 1, 1], [], []>} : vector<8x32xf32>, vector<32x128xf32>, vector<8x128xf32> -> vector<8x128xf32>
    %c0_12 = arith.constant 0 : index
    %c0_13 = arith.constant 0 : index
    %c0_14 = arith.constant 0 : index
    %12 = vector.load %arg7[%c0_12, %c0_13, %c0_14] : memref<1x1x128xf32, #tpu.memory_space<vmem>>, vector<1x1x128xf32>
    %13 = vector.shape_cast %12 : vector<1x1x128xf32> to vector<1x128xf32>
    %14 = vector.broadcast %13 : vector<1x128xf32> to vector<8x128xf32>
    %15 = arith.addf %11, %14 : vector<8x128xf32>
    %c0_15 = arith.constant 0 : index
    %c0_16 = arith.constant 0 : index
    %c0_17 = arith.constant 0 : index
    %16 = vector.load %arg5[%c0_15, %c0_16, %c0_17] : memref<1x32x128xf32, #tpu.memory_space<vmem>>, vector<1x32x128xf32>
    %17 = vector.shape_cast %16 : vector<1x32x128xf32> to vector<32x128xf32>
    %cst_18 = arith.constant dense<0.000000e+00> : vector<8x128xf32>
    %18 = tpu.matmul %1, %17, %cst_18 {dimension_numbers = #tpu.dot_dimension_numbers<[1], [0], [0], [1], [0, 0, 1, 1], [], []>} : vector<8x32xf32>, vector<32x128xf32>, vector<8x128xf32> -> vector<8x128xf32>
    %c0_19 = arith.constant 0 : index
    %c0_20 = arith.constant 0 : index
    %c0_21 = arith.constant 0 : index
    %19 = vector.load %arg8[%c0_19, %c0_20, %c0_21] : memref<1x1x128xf32, #tpu.memory_space<vmem>>, vector<1x1x128xf32>
    %20 = vector.shape_cast %19 : vector<1x1x128xf32> to vector<1x128xf32>
    %21 = vector.broadcast %20 : vector<1x128xf32> to vector<8x128xf32>
    %22 = arith.addf %18, %21 : vector<8x128xf32>
    %c0_22 = arith.constant 0 : index
    %c0_23 = arith.constant 0 : index
    %c0_24 = arith.constant 0 : index
    %c0_25 = arith.constant 0 : index
    %23 = vector.load %arg9[%c0_22, %c0_23, %c0_24, %c0_25] : memref<1x1x8x128xf32, #tpu.memory_space<vmem>>, vector<1x1x8x128xf32>
    %24 = vector.shape_cast %23 : vector<1x1x8x128xf32> to vector<8x128xf32>
    %25 = vector.shape_cast %8 : vector<8x128xf32> to vector<1x1x8x128xf32>
    tpu.vector_store %arg9[%c0_22, %c0_23, %c0_24, %c0_25], %25 {strides = array<i32>} : memref<1x1x8x128xf32, #tpu.memory_space<vmem>>, vector<1x1x8x128xf32>,
    %c0_26 = arith.constant 0 : index
    %c0_27 = arith.constant 0 : index
    %c0_28 = arith.constant 0 : index
    %c0_29 = arith.constant 0 : index
    %26 = vector.load %arg10[%c0_26, %c0_27, %c0_28, %c0_29] : memref<1x1x8x128xf32, #tpu.memory_space<vmem>>, vector<1x1x8x128xf32>
    %27 = vector.shape_cast %26 : vector<1x1x8x128xf32> to vector<8x128xf32>
    %28 = vector.shape_cast %15 : vector<8x128xf32> to vector<1x1x8x128xf32>
    tpu.vector_store %arg10[%c0_26, %c0_27, %c0_28, %c0_29], %28 {strides = array<i32>} : memref<1x1x8x128xf32, #tpu.memory_space<vmem>>, vector<1x1x8x128xf32>,
    %c0_30 = arith.constant 0 : index
    %c0_31 = arith.constant 0 : index
    %c0_32 = arith.constant 0 : index
    %c0_33 = arith.constant 0 : index
    %29 = vector.load %arg11[%c0_30, %c0_31, %c0_32, %c0_33] : memref<1x1x8x128xf32, #tpu.memory_space<vmem>>, vector<1x1x8x128xf32>
    %30 = vector.shape_cast %29 : vector<1x1x8x128xf32> to vector<8x128xf32>
    %31 = vector.shape_cast %22 : vector<8x128xf32> to vector<1x1x8x128xf32>
    tpu.vector_store %arg11[%c0_30, %c0_31, %c0_32, %c0_33], %31 {strides = array<i32>} : memref<1x1x8x128xf32, #tpu.memory_space<vmem>>, vector<1x1x8x128xf32>,
    return
  }
  func.func @transform_0(%arg0: i32, %arg1: i32) -> (i32, i32, i32) {
    %c0_i32 = arith.constant 0 : i32
    %c0_i32_0 = arith.constant 0 : i32
    %c0_i32_1 = arith.constant 0 : i32
    return %arg0, %c0_i32, %c0_i32_0 : i32, i32, i32
  }
  func.func @transform_1(%arg0: i32, %arg1: i32) -> (i32, i32, i32) {
    %c0_i32 = arith.constant 0 : i32
    %c0_i32_0 = arith.constant 0 : i32
    %c0_i32_1 = arith.constant 0 : i32
    return %arg1, %c0_i32, %c0_i32_0 : i32, i32, i32
  }
  func.func @transform_2(%arg0: i32, %arg1: i32) -> (i32, i32, i32) {
    %c0_i32 = arith.constant 0 : i32
    %c0_i32_0 = arith.constant 0 : i32
    %c0_i32_1 = arith.constant 0 : i32
    return %arg1, %c0_i32, %c0_i32_0 : i32, i32, i32
  }
  func.func @transform_3(%arg0: i32, %arg1: i32) -> (i32, i32, i32) {
    %c0_i32 = arith.constant 0 : i32
    %c0_i32_0 = arith.constant 0 : i32
    %c0_i32_1 = arith.constant 0 : i32
    return %arg1, %c0_i32, %c0_i32_0 : i32, i32, i32
  }
  func.func @transform_4(%arg0: i32, %arg1: i32) -> (i32, i32, i32) {
    %c0_i32 = arith.constant 0 : i32
    %c0_i32_0 = arith.constant 0 : i32
    %c0_i32_1 = arith.constant 0 : i32
    return %arg1, %c0_i32, %c0_i32_0 : i32, i32, i32
  }
  func.func @transform_5(%arg0: i32, %arg1: i32) -> (i32, i32, i32) {
    %c0_i32 = arith.constant 0 : i32
    %c0_i32_0 = arith.constant 0 : i32
    %c0_i32_1 = arith.constant 0 : i32
    return %arg1, %c0_i32, %c0_i32_0 : i32, i32, i32
  }
  func.func @transform_6(%arg0: i32, %arg1: i32) -> (i32, i32, i32) {
    %c0_i32 = arith.constant 0 : i32
    %c0_i32_0 = arith.constant 0 : i32
    %c0_i32_1 = arith.constant 0 : i32
    return %arg1, %c0_i32, %c0_i32_0 : i32, i32, i32
  }
  func.func @transform_7(%arg0: i32, %arg1: i32) -> (i32, i32, i32, i32) {
    %c0_i32 = arith.constant 0 : i32
    %c0_i32_0 = arith.constant 0 : i32
    %c0_i32_1 = arith.constant 0 : i32
    return %arg0, %arg1, %c0_i32, %c0_i32_0 : i32, i32, i32, i32
  }
  func.func @transform_8(%arg0: i32, %arg1: i32) -> (i32, i32, i32, i32) {
    %c0_i32 = arith.constant 0 : i32
    %c0_i32_0 = arith.constant 0 : i32
    %c0_i32_1 = arith.constant 0 : i32
    return %arg0, %arg1, %c0_i32, %c0_i32_0 : i32, i32, i32, i32
  }
  func.func @transform_9(%arg0: i32, %arg1: i32) -> (i32, i32, i32, i32) {
    %c0_i32 = arith.constant 0 : i32
    %c0_i32_0 = arith.constant 0 : i32
    %c0_i32_1 = arith.constant 0 : i32
    return %arg0, %arg1, %c0_i32, %c0_i32_0 : i32, i32, i32, i32
  }
}

</mosaic_0001>

<bundles_post_ra>
// kernel: tpu_custom_call.1
= control target key start
LH: loop header
LB: loop body
LE: loop exit
PB: predicated region body
PF: predicated region fallthrough
CT: control target
= control target key end

     0   :  { %s2244_s0 = inlined_call_operand.hbm [shape: f32[2,8,32], index: 0, kind: input, shape index: {}]   ;;  %s2245_s1 = inlined_call_operand.hbm [shape: f32[4,32,128], index: 1, kind: input, shape index: {}]   ;;  %s2246_s2 = inlined_call_operand.hbm [shape: f32[4,32,128], index: 2, kind: input, shape index: {}]   ;;  %s2247_s3 = inlined_call_operand.hbm [shape: f32[4,32,128], index: 3, kind: input, shape index: {}]   ;;  %s2248_s4 = inlined_call_operand.vmem [shape: f32[4,1,128], index: 4, kind: input, shape index: {}]   ;;  %s2249_s5 = inlined_call_operand.vmem [shape: f32[4,1,128], index: 5, kind: input, shape index: {}]   ;;  %s2250_s6 = inlined_call_operand.hbm [shape: f32[4,1,128], index: 6, kind: input, shape index: {}]   ;;  %s2251_s7 = inlined_call_operand.hbm [shape: f32[2,4,8,128], index: 7, kind: output, shape index: {0}]   ;;  %s2252_s8 = inlined_call_operand.hbm [shape: f32[2,4,8,128], index: 8, kind: output, shape index: {1}]   ;;  %s2253_s9 = inlined_call_operand.hbm [shape: f32[2,4,8,128], index: 9, kind: output, shape index: {2}]  }
   0x1   :  { %2276 = sst [smem:[#allocation35_spill]] %s2245_s1 }
   0x2   :  { %2277 = sst [smem:[#allocation36_spill]] %s2246_s2 }
   0x3   :  { %2278 = sst [smem:[#allocation37_spill]] %s2247_s3 }
   0x4   :  { %2279 = sst [smem:[#allocation38_spill]] %s2248_s4 }
   0x5   :  { %2280 = sst [smem:[#allocation39_spill]] %s2249_s5 }
   0x6   :  { %2281 = sst [smem:[#allocation40_spill]] %s2250_s6 }
   0x7   :  { %2282 = sst [smem:[#allocation41_spill]] %s2251_s7 }
   0x8   :  { %2283 = sst [smem:[#allocation42_spill]] %s2252_s8 }
   0x9   :  { %2284 = sst [smem:[#allocation43_spill]] %s2253_s9 }
   0xa   :  { %15 = vsyncpa [#allocation3], 0 }
   0xb   :  { %17 = vsyncpa [#allocation3 + $0x1], 0 }
   0xc   :  { %18 = vsyncpa [#allocation6], 0 }
   0xd   :  { %20 = vsyncpa [#allocation6 + $0x1], 0 }
   0xe   :  { %21 = vsyncpa [#allocation9], 0 }
   0xf   :  { %23 = vsyncpa [#allocation9 + $0x1], 0 }
  0x10   :  { %24 = vsyncpa [#allocation4], 0 }
  0x11   :  { %26 = vsyncpa [#allocation4 + $0x1], 0 }
  0x12   :  { %27 = vsyncpa [#allocation13], 0 }
  0x13   :  { %29 = vsyncpa [#allocation13 + $0x1], 0  ;;  %s1780_s30 = smov 0   ;;  %s1782_s10 = smov 0  }
  0x14   :  { %s1784_s11 = smov 0   ;;  %s1786_s12 = smov 0  }
  0x15   :  { %s1788_s13 = smov 0   ;;  %s1790_s14 = smov 0  }
  0x16   :  { %s1792_s15 = smov 0   ;;  %s1794_s16 = smov 0  }
  0x17   :  { %s1796_s17 = smov 0   ;;  %s1798_s18 = smov 0  }
  0x18   :  { %s1800_s19 = smov 0   ;;  %s1802_s20 = smov 0  }
  0x19   :  { %s1804_s21 = smov 0   ;;  %s1806_s22 = smov 0  }
  0x1a LB: > { %2285 = sst [smem:[#allocation20_spill]] %s1664_s30  ;;  %p62_p0 = scmp.eq.s32.totalorder %s1716_s22, 0  ;;  %s1716_s22 = sphi %s1806_s22, %s35_s22   ;;  %s1712_s21 = sphi %s1804_s21, %s2348_s21   ;;  %s1708_s20 = sphi %s1802_s20, %s2358_s20   ;;  %s1704_s19 = sphi %s1800_s19, %s2357_s19   ;;  %s1700_s18 = sphi %s1798_s18, %s2356_s18   ;;  %s1696_s17 = sphi %s1796_s17, %s2345_s17   ;;  %s1692_s16 = sphi %s1794_s16, %s2355_s16   ;;  %s1688_s15 = sphi %s1792_s15, %s2354_s15   ;;  %s1684_s14 = sphi %s1790_s14, %s2353_s14   ;;  %s1680_s13 = sphi %s1788_s13, %s2352_s13   ;;  %s1676_s12 = sphi %s1786_s12, %s2342_s12   ;;  %s1672_s11 = sphi %s1784_s11, %s2341_s11   ;;  %s1668_s10 = sphi %s1782_s10, %s2351_s10   ;;  %s1664_s30 = sphi %s1780_s30, %s2350_s30  }
  0x1b   : > { %2286 = sst [smem:[#allocation21_spill]] %s1672_s11  ;;  %p87_p1 = scmp.ne.s32.totalorder %s1684_s14, %s1680_s13 }
  0x1c   : > { %2287 = sst [smem:[#allocation22_spill]] %s1680_s13  ;;  %p1250_p2 = scmp.lt.s32.totalorder %s1716_s22, 8 }
  0x1d   : > { %2288 = sst [smem:[#allocation23_spill]] %s1696_s17  ;;  %p89_p3 = por %p87_p1, %p62_p0 }
  0x1e   : > { %2289 = sst [smem:[#allocation24_spill]] %s1700_s18  ;;  %s2257_s25 = sand.u32 1, %s1684_s14  }
  0x1f   : > { %2290 = sst [smem:[#allocation25_spill]] %s1704_s19  ;;  %s1860_s26 = sshll.u32 %s1708_s20, 9 }
  0x20   : > { %2291 = sst [smem:[#allocation26_spill]] %s1712_s21  ;;  %s1864_s27 = sshll.u32 %s2257_s25, 5 }
  0x21   : > { %s2292_s1 = sld [smem:[#allocation35_spill]]  ;;  %p1872_p4 = pnand %p1250_p2, %p89_p3 }
  0x22   : > { %s353_s24 = scalar_lea.vmem [#allocation5], %s1864_s27  ;;  %p1132_p5 = scmp.ge.s32.totalorder %s1716_s22, 1 }
  0x23   : > { %s360_s8 = sshll.u32 %s353_s24, 4  ;;  %s2294_s7 = sand.u32 1, %s1716_s22   ;;  %s361_s8 = int_to_ptr.vmem [resolvable:$true] %s360_s8 }
  0x24   : > { %s1880_s5 = scalar_lea.sflag [#allocation6], %s2294_s7  ;;  %p2274_p6 = pneg %p1872_p4 }
  0x25   : > { %s1381_s25 = scalar_lea.vmem %s361_s8, 512  ;;  %s1718_s28 = smov [#allocation5]  }
  0x26   : > { %p1382_p7 = scmp.ne.s32.totalorder %s361_s8, %s1381_s25  ;;  %s1386_s29 = sshll.u32 %s1718_s28, 4  ;;  %s1387_s29 = int_to_ptr.vmem [resolvable:$false] %s1386_s29 }
  0x27   : > { %s359_s9 = scalar_lea.hbm %s2292_s1, %s1860_s26  ;;  %s1388_s1 = scalar_lea.vmem %s1387_s29, 1024 }
  0x28   : > { %p1384_p8 = pnand %p1382_p7, %p2274_p6  ;;  %p1389_p10 = scmp.lt.s32.totalorder %s361_s8, %s1387_s29 }
  0x29   : > { %p1390_p11 = scmp.lt.s32.totalorder %s1388_s1, %s1381_s25 }
  0x2a   : > { %p1385_p9 = pneg %p1384_p8 }
  0x2b   : > { %p1391_p12 = por %p1390_p11, %p1389_p10 }
  0x2d   : > { %p1392_p13 = pnand %p1391_p12, %p1385_p9 }
  0x2f   : > { %1395 = shalt.err (!%p1392_p13)
}
  0x30   : > { %s2260_s24 = smov 128   ;;  %s2261_s7 = smov 8  }
  0x31   : > { %1230 = dma.hbm_to_vmem [thread:$0]  (!%p1872_p4), %s359_s9, 512, %s361_s8, %s1880_s5, %s2260_s24, %s2260_s24, %s2261_s7  }
  0x32   : > { %p439_p1 = scmp.lt.s32.totalorder %s1716_s22, 9  ;;  %s2295_s3 = sld [smem:[#allocation37_spill]] }
  0x33   : > { %s395_s4 = scalar_lea.vmem [#allocation8], %s1864_s27  ;;  %s2297_s18 = sand.u32 1, %s1716_s22  }
  0x34   : > { %p1900_p3 = pnand %p1132_p5, %p439_p1  ;;  %s402_s19 = sshll.u32 %s395_s4, 4  ;;  %s403_s19 = int_to_ptr.vmem [resolvable:$true] %s402_s19 }
  0x35   : > { %s1907_s6 = scalar_lea.sflag [#allocation9], %s2297_s18  ;;  %s1409_s2 = scalar_lea.vmem %s403_s19, 512 }
  0x36   : > { %p1410_p7 = scmp.ne.s32.totalorder %s403_s19, %s1409_s2  ;;  %s1721_s8 = smov [#allocation8]  }
  0x37   : > { %s1414_s9 = sshll.u32 %s1721_s8, 4  ;;  %s1415_s9 = int_to_ptr.vmem [resolvable:$false] %s1414_s9 }
  0x38   : > { %s401_s28 = scalar_lea.hbm %s2295_s3, %s1860_s26  ;;  %p1412_p8 = pnand %p1410_p7, %p2274_p6 }
  0x39   : > { %s1416_s1 = scalar_lea.vmem %s1415_s9, 1024  ;;  %p1417_p5 = scmp.lt.s32.totalorder %s403_s19, %s1415_s9 }
  0x3a   : > { %p1413_p9 = pneg %p1412_p8  ;;  %p1418_p10 = scmp.lt.s32.totalorder %s1416_s1, %s1409_s2 }
  0x3c   : > { %p1419_p11 = por %p1418_p10, %p1417_p5 }
  0x3e   : > { %p1420_p12 = pnand %p1419_p11, %p1413_p9 }
  0x40   : > { %1423 = shalt.err (!%p1420_p12)
}
  0x41   : > { %1236 = dma.hbm_to_vmem [thread:$0]  (!%p1872_p4), %s401_s28, 512, %s403_s19, %s1907_s6, %s2260_s24, %s2260_s24, %s2261_s7  }
  0x42   : > { %s1919_s2 = sadd.s32 4294967295, %s1716_s22   ;;  %s44_s18 = sadd.s32 1, %s1708_s20 }
  0x43   : > { %2298 = sst [smem:[#allocation27_spill]] %s1919_s2  ;;  %p45_p13 = scmp.ge.s32.totalorder %s44_s18, 4 }
  0x44   : > { %s47_s25 = sadd.s32 1, %s1712_s21  ;;  %s54_s8 = sadd.s32 1, %s1696_s17 }
  0x45   : > { %p61_p1 = scmp.ne.s32.totalorder %s1696_s17, %s1692_s16  ;;  %s2360_s18 = smov (%p45_p13, %s44_s18), 0 }
  0x46   : > { %2299 = sst [smem:[#allocation28_spill]] %s2360_s18  ;;  %s2362_s25 = smov (!%p45_p13, %s47_s25), %s1712_s21 }
  0x47   : > { %p1932_p7 = por %p62_p0, %p61_p1  ;;  %p67_p8 = scmp.ne.s32.totalorder %s1692_s16, %s1688_s15 }
  0x48   : > { %p49_p9 = scmp.ge.s32.totalorder %s2362_s25, 2  ;;  %p68_p5 = scmp.eq.s32.totalorder %s1919_s2, 0 }
  0x49   : > { %s77_s28 = ssub.s32 %s1708_s20, %s2360_s18  ;;  %p93_p10 = scmp.ne.s32.totalorder %s1680_s13, %s1676_s12 }
  0x4a   : > { %s2364_s25 = smov (%p49_p9, %s2362_s25), 0  ;;  %p1945_p0 = por %p68_p5, %p67_p8 }
  0x4b   : > { %2301 = sst [smem:[#allocation29_spill]] %s2364_s25  ;;  %p78_p11 = scmp.eq.s32.totalorder %s77_s28, 0 }
  0x4c   : > { %s51_s15 = ssub.s32 %s1712_s21, %s2364_s25  ;;  %p1951_p12 = por %p93_p10, %p68_p5 }
  0x4d   : > { %p52_p13 = scmp.eq.s32.totalorder %s51_s15, 0  ;;  %s235_s12 = sor.u32 %s77_s28, %s51_s15 }
  0x4e   : > { %s2303_s1 = scalar_select %p1951_p12, 1, 0 }
  0x4f   : > { %s2305_s24 = sadd.s32 1, %s1684_s14  ;;  %p236_p1 = scmp.eq.s32.totalorder %s235_s12, 0 }
  0x50   : > { %2304 = sst [smem:[#allocation30_spill]] %s2303_s1  ;;  %s238_s3 = sadd.s32 1, %s1672_s11 }
  0x51   : > { %s1958_s7 = scalar_select %p78_p11, %s1684_s14, %s2305_s24  }
  0x52   : > { %s1961_s4 = scalar_select %p52_p13, %s1696_s17, %s54_s8  }
  0x53   : > { %2306 = sst [smem:[#allocation31_spill]] %s1958_s7  ;;  %p248_p8 = scmp.ne.s32.totalorder %s1672_s11, %s1668_s10 }
  0x54   : > { %2307 = sst [smem:[#allocation32_spill]] %s1961_s4  ;;  %p249_p9 = scmp.eq.s32.totalorder %s1919_s2, 7 }
  0x55   : > { %s1968_s25 = scalar_select %p236_p1, %s1672_s11, %s238_s3  }
  0x56   : > { %p1970_p5 = por %p249_p9, %p248_p8  ;;  %p254_p10 = scmp.ne.s32.totalorder %s1668_s10, %s1664_s30 }
  0x57   : > { %2308 = sst [smem:[#allocation33_spill]] %s1968_s25  ;;  %s2310_s28 = sadd.s32 4294967294, %s1716_s22  }
  0x58   : > { %s2309_s18 = scalar_select %p1970_p5, 1, 0 }
  0x59   : > { %p255_p11 = scmp.eq.s32.totalorder %s2310_s28, 7  ;;  %s331_s24 = sand.u32 1, %s1696_s17  }
  0x5a   : > { %s1120_s8 = sshll.u32 %s331_s24, 3  ;;  %s1121_s12 = sshll.u32 %s1712_s21, 7 }
  0x5b   : > { %p1979_p13 = por %p255_p11, %p254_p10  ;;  %s335_s4 = scalar_lea.vmem [#allocation2], %s1120_s8 }
  0x5c   : > { %s342_s7 = sshll.u32 %s335_s4, 4  ;;  %s340_s3 = scalar_lea.hbm %s2244_s0, %s1121_s12  ;;  %s343_s7 = int_to_ptr.vmem [resolvable:$true] %s342_s7 }
  0x5d   : > { %s2311_s15 = scalar_select %p1979_p13, 1, 0 }
  0x5e   : > { %p1991_p1 = pnand %p1250_p2, %p1932_p7  ;;  %s2314_s11 = sld [smem:[#allocation36_spill]] }
  0x5f   : > { %2312 = sst [smem:[#allocation34_spill]] %s2311_s15  ;;  %s374_s15 = scalar_lea.vmem [#allocation7], %s1864_s27 }
  0x60   : > { %s381_s21 = sshll.u32 %s374_s15, 4  ;;  %s332_s4 = scalar_lea.sflag [#allocation3], %s331_s24  ;;  %s2000_s21 = int_to_ptr.vmem [resolvable:$true] %s381_s21 }
  0x61   : > { %p1426_p8 = pneg %p1991_p1  ;;  %s1437_s13 = scalar_lea.vmem %s343_s7, 128 }
  0x62   : > { %p1438_p9 = scmp.ne.s32.totalorder %s343_s7, %s1437_s13  ;;  %s1722_s19 = smov [#allocation2]  }
  0x63   : > { %s1442_s1 = sshll.u32 %s1722_s19, 4  ;;  %s1443_s1 = int_to_ptr.vmem [resolvable:$false] %s1442_s1 }
  0x64   : > { %s380_s30 = scalar_lea.hbm %s2314_s11, %s1860_s26  ;;  %p1440_p10 = pnand %p1438_p9, %p1426_p8 }
  0x65   : > { %s1444_s8 = scalar_lea.vmem %s1443_s1, 256  ;;  %p1445_p2 = scmp.lt.s32.totalorder %s343_s7, %s1443_s1 }
  0x66   : > { %p1441_p11 = pneg %p1440_p10  ;;  %p1446_p7 = scmp.lt.s32.totalorder %s1444_s8, %s1437_s13 }
  0x68   : > { %p1447_p6 = por %p1446_p7, %p1445_p2 }
  0x6a   : > { %p1448_p13 = pnand %p1447_p6, %p1441_p11 }
  0x6c   : > { %1451 = shalt.err (!%p1448_p13)
}
  0x6d   : > { %1227 = dma.hbm_to_vmem [thread:$0]  (!%p1991_p1), %s340_s3, 128, %s343_s7, %s332_s4  }
  0x6e   : > { %s1465_s11 = scalar_lea.vmem %s2000_s21, 512  ;;  %p2316_p8 = pneg %p1872_p4 }
  0x6f   : > { %p1466_p5 = scmp.ne.s32.totalorder %s2000_s21, %s1465_s11  ;;  %s1723_s17 = smov [#allocation7]  }
  0x70   : > { %s1470_s27 = sshll.u32 %s1723_s17, 4  ;;  %s1471_s27 = int_to_ptr.vmem [resolvable:$false] %s1470_s27 }
  0x71   : > { %p1468_p9 = pnand %p1466_p5, %p2316_p8  ;;  %s1472_s24 = scalar_lea.vmem %s1471_s27, 1024 }
  0x72   : > { %p1473_p2 = scmp.lt.s32.totalorder %s2000_s21, %s1471_s27  ;;  %p1474_p6 = scmp.lt.s32.totalorder %s1472_s24, %s1465_s11 }
  0x73   : > { %p1469_p10 = pneg %p1468_p9 }
  0x74   : > { %p1475_p13 = por %p1474_p6, %p1473_p2 }
  0x76   : > { %p1476_p11 = pnand %p1475_p13, %p1469_p10 }
  0x78   : > { %1479 = shalt.err (!%p1476_p11)
}
  0x79   : > { %s2317_s25 = smov 8   ;;  %s2318_s15 = smov 128  }
  0x7a   : > { %1233 = dma.hbm_to_vmem [thread:$0]  (!%p1872_p4), %s380_s30, 512, %s2000_s21, %s1880_s5, %s2318_s15, %s2318_s15, %s2317_s25  }
  0x7b   : > { %s1131_s3 = sshll.u32 %s1708_s20, 4  ;;  %s2319_s13 = sld [smem:[#allocation40_spill]] }
  0x7c   : > { %s2320_s1 = sand.u32 1, %s1684_s14   ;;  %p2321_p1 = pmov %p2316_p8 }
  0x7d   : > { %s427_s8 = scalar_lea.vmem [#allocation10], %s2320_s1  ;;  %s1724_s26 = smov [#allocation10]  }
  0x7e   : > { %s434_s11 = sshll.u32 %s427_s8, 4  ;;  %s1498_s27 = sshll.u32 %s1724_s26, 4  ;;  %s435_s11 = int_to_ptr.vmem [resolvable:$true] %s434_s11  ;;  %s1499_s27 = int_to_ptr.vmem [resolvable:$false] %s1498_s27 }
  0x7f   : > { %s1493_s17 = scalar_lea.vmem %s435_s11, 16  ;;  %s1500_s24 = scalar_lea.vmem %s1499_s27, 32 }
  0x80   : > { %p1494_p5 = scmp.ne.s32.totalorder %s435_s11, %s1493_s17  ;;  %p1501_p9 = scmp.lt.s32.totalorder %s435_s11, %s1499_s27 }
  0x81   : > { %s432_s19 = scalar_lea.hbm %s2319_s13, %s1131_s3  ;;  %p1502_p10 = scmp.lt.s32.totalorder %s1500_s24, %s1493_s17 }
  0x82   : > { %p1496_p7 = pnand %p1494_p5, %p2321_p1 }
  0x83   : > { %p1503_p2 = por %p1502_p10, %p1501_p9 }
  0x84   : > { %p1497_p8 = pneg %p1496_p7 }
  0x86   : > { %p1504_p6 = pnand %p1503_p2, %p1497_p8 }
  0x88   : > { %1507 = shalt.err (!%p1504_p6)
}
  0x89   : > { %1239 = dma.hbm_to_vmem [thread:$0]  (!%p1872_p4), %s432_s19, 16, %s435_s11, %s1907_s6  }
  0x8a   : > { %443 = sbr.rel (%p1900_p3) target bundleno = 421 (0x1a5), region = 48  ;;  %s445_s5 = sand.u32 (!%p1900_p3), 1, %s1692_s16  }
  0x8b   : > { %s2039_s30 = sshll.u32 (!%p1900_p3), %s445_s5, 3  ;;  %s446_s21 = scalar_lea.sflag (!%p1900_p3), [#allocation3], %s445_s5 }
  0x8c   : > { %s449_s25 = scalar_lea.vmem (!%p1900_p3), [#allocation2], %s2039_s30 }
  0x8f   : > { %1643 = dma.done.wait (%p1945_p0), %s446_s21, 128  }
  0x90   : > { %1645 = vsyncadd (%p1945_p0), %s446_s21, 4294967168  ;;  %s2322_s15 = sld [smem:[#allocation27_spill]] }
  0x91   : > { %s2323_s23 = sld [smem:[#allocation22_spill]] }
  0x96   : > { %s2047_s7 = sand.u32 1, %s2322_s15  }
  0x97   : > { %s456_s29 = sand.u32 1, %s2323_s23   ;;  %s455_s3 = scalar_lea.sflag [#allocation6], %s2047_s7 }
  0x98   : > { %s1134_s12 = sshll.u32 %s456_s29, 5 }
  0x99   : > { %s458_s28 = scalar_lea.vmem [#allocation5], %s1134_s12 }
  0x9a   : > { %1647 = dma.done.wait (%p1951_p12), %s455_s3, 1024  }
  0x9b   : > { %1649 = vsyncadd (%p1951_p12), %s455_s3, 4294966272  ;;  %s2057_s9 = scalar_lea.vmem [#allocation7], %s1134_s12  ;;  %s473_s4 = scalar_lea.sflag [#allocation9], %s2047_s7 }
  0x9c   : > { %s2060_s13 = scalar_lea.vmem [#allocation8], %s1134_s12 }
  0x9d   : > { %1651 = dma.done.wait (%p1951_p12), %s473_s4, 528  }
  0x9e   : > { %1653 = vsyncadd (%p1951_p12), %s473_s4, 4294966768  ;;  %v1725_v0 = vmov 0.0   ;;  %vm1726_vm0 = vmmov 0   ;;  %v564_v1 = vld [vmem:[%s458_s28 + $0x18] sm:$0xff]  ;;  %v563_v2 = vld [vmem:[%s458_s28 + $0x10] sm:$0xff]  ;;  %vm572_vm1 = vcmask 261120  }
  0x9f   : > { %1175 = vmatprep.subr.mxu0 %v1725_v0  ;;  %1186 = vmatprep.subr.mxu1 %v1725_v0  ;;  %v649_v3 = vld [vmem:[%s2057_s9 + $0x18] sm:$0xff]  ;;  %v562_v4 = vld [vmem:[%s458_s28 + $0x8] sm:$0xff]  ;;  %v648_v5 = vld [vmem:[%s2057_s9 + $0x10] sm:$0xff]  ;;  %s2325_s19 = sld [smem:[#allocation24_spill]]  ;;  %s537_s8 = sand.u32 1, %s1668_s10  }
  0xa0   : > { %1183 = vmatprep.mubr.msk.f32.mxu0 %vm1726_vm0, %v1725_v0  ;;  %1194 = vmatprep.mubr.msk.f32.mxu1 %vm1726_vm0, %v1725_v0  ;;  %v647_v6 = vld [vmem:[%s2057_s9 + $0x8] sm:$0xff]  ;;  %v561_v7 = vld [vmem:[%s458_s28] sm:$0xff]  ;;  %v560_v8 = vld [vmem:[%s449_s25] sm:$0xff]  ;;  %s2326_s1 = sld [smem:[#allocation25_spill]]  ;;  %s2086_s26 = sshll.u32 %s537_s8, 3 }
  0xa1   : > { %1176 = vmatpush3.msra.mxu0 %v564_v1  ;;  %1187 = vmatpush3.msra.mxu1 %v649_v3  ;;  %v730_v9 = vld [vmem:[%s2060_s13 + $0x18] sm:$0xff]  ;;  %v646_v10 = vld [vmem:[%s2057_s9] sm:$0xff]  ;;  %v729_v11 = vld [vmem:[%s2060_s13 + $0x10] sm:$0xff]  ;;  %s2327_s5 = sld [smem:[#allocation38_spill]]  ;;  %s539_s28 = scalar_lea.vmem [#allocation11], %s2086_s26 }
  0xa2   : > { %1177 = vmatprep.subr.mxu0 %v1725_v0  ;;  %1188 = vmatprep.subr.mxu1 %v1725_v0  ;;  %v728_v12 = vld [vmem:[%s2060_s13 + $0x8] sm:$0xff]  ;;  %v727_v13 = vld [vmem:[%s2060_s13] sm:$0xff]  ;;  %s2328_s6 = sld [smem:[#allocation39_spill]]  ;;  %s837_s9 = sshll.u32 %s539_s28, 4  ;;  %s2107_s9 = int_to_ptr.vmem [resolvable:$true] %s837_s9 }
  0xa3   : > { %1178 = vmatpush3.msra.mxu0 %v563_v2  ;;  %1189 = vmatpush3.msra.mxu1 %v648_v5  ;;  %s546_s4 = scalar_lea.vmem [#allocation12], %s2086_s26  ;;  %s812_s15 = scalar_lea.sflag [#allocation4], %s537_s8 }
  0xa4   : > { %1179 = vmatprep.subr.mxu0 %v1725_v0  ;;  %1190 = vmatprep.subr.mxu1 %v1725_v0  ;;  %s852_s13 = sshll.u32 %s546_s4, 4  ;;  %p2333_p0 = scmp.ne.s32.totalorder %s2309_s18, 0  ;;  %s2115_s13 = int_to_ptr.vmem [resolvable:$true] %s852_s13 }
  0xa5   : > { %1180 = vmatpush3.msra.mxu0 %v562_v4  ;;  %1191 = vmatpush3.msra.mxu1 %v647_v6  ;;  %p554_p4 = scmp.lt.s32.totalorder %s2325_s19, 3 }
  0xa6   : > { %1181 = vmatprep.subr.mxu0 %v1725_v0  ;;  %1192 = vmatprep.subr.mxu1 %v1725_v0  ;;  %s1149_s17 = sshll.u32 %s2326_s1, 2 }
  0xa7   : > { %1182 = vmatpush3.msra.mxu0 %v561_v7  ;;  %1193 = vmatpush3.msra.mxu1 %v646_v10  ;;  %s555_s11 = scalar_select %p554_p4, %s2325_s19, 3 }
  0xa8   : > { %1184 = vmatmul.mubr.msk.f32.vlgmr.msra.gmra.mxu0 %vm572_vm1, %v560_v8  ;;  %1197 = vmatprep.subr.mxu0 %v1725_v0  ;;  %s833_s21 = sadd.s32 %s2325_s19, %s1149_s17  ;;  %s2329_s17 = sld [smem:[#allocation41_spill]] }
  0xa9   : > { %1198 = vmatpush3.msra.mxu0 %v730_v9  ;;  %1195 = vmatmul.mubr.msk.f32.vlgmr.msra.gmra.mxu1 %vm572_vm1, %v560_v8  ;;  %s556_s30 = scalar_lea.vmem %s2327_s5, %s555_s11  ;;  %s559_s12 = scalar_lea.vmem %s2328_s6, %s555_s11 }
  0xaa   : > { %1199 = vmatprep.subr.mxu0 %v1725_v0  ;;  %1205 = vmatprep.mubr.msk.f32.mxu0 %vm1726_vm0, %v1725_v0  ;;  %v1140_v14 = vld [vmem:[%s556_s30] ss:$0 sm:$0xff]  ;;  %s2095_s3 = sshll.u32 %s833_s21, 7  ;;  %s2331_s30 = sld [smem:[#allocation42_spill]] }
  0xab   : > { %1200 = vmatpush3.msra.mxu0 %v729_v11  ;;  %v1142_v16 = vld [vmem:[%s559_s12] ss:$0 sm:$0xff]  ;;  %s1508_s6 = scalar_lea.vmem %s2107_s9, 128  ;;  %s1727_s12 = smov [#allocation11]  }
  0xac   : > { %1201 = vmatprep.subr.mxu0 %v1725_v0  ;;  %p1509_p3 = scmp.ne.s32.totalorder %s2107_s9, %s1508_s6  ;;  %s1512_s1 = sshll.u32 %s1727_s12, 4  ;;  %s1513_s1 = int_to_ptr.vmem [resolvable:$false] %s1512_s1 }
  0xad   : > { %1202 = vmatpush3.msra.mxu0 %v728_v12  ;;  %s1514_s19 = scalar_lea.vmem %s1513_s1, 256  ;;  %p1515_p11 = scmp.lt.s32.totalorder %s2107_s9, %s1513_s1 }
  0xae   : > { %1203 = vmatprep.subr.mxu0 %v1725_v0  ;;  %s2330_s27 = smov %s2329_s17  ;;  %s2105_s24 = scalar_lea.hbm %s2329_s17, %s2095_s3 }
  0xaf   : > { %1204 = vmatpush3.msra.mxu0 %v727_v13  ;;  %p1510_p12 = pnand %p1509_p3, %p2333_p0  ;;  %p1516_p5 = scmp.lt.s32.totalorder %s1514_s19, %s1508_s6 }
  0xb0   : > { %1206 = vmatmul.mubr.msk.f32.vlgmr.msra.gmra.mxu0 %vm572_vm1, %v560_v8  ;;  %s2332_s25 = smov %s2331_s30  ;;  %s2113_s21 = scalar_lea.hbm %s2331_s30, %s2095_s3 }
  0xb1   : > { %p1511_p13 = pneg %p1510_p12  ;;  %p1517_p1 = por %p1516_p5, %p1515_p11 }
  0xb3   : > { %p1518_p7 = pnand %p1517_p1, %p1511_p13 }
 0x168   : > { %v642_v15 = vpop.f32.mrf.mxu0 }
 0x169   : > { %v643_v17 = vadd.f32 %v1140_v14, %v642_v15  ;;  %v723_v19 = vpop.f32.mrf.mxu1 }
 0x16a   : > { %v1185_v18 = vpop.f32.mrf.mxu0  ;;  %v724_v20 = vadd.f32 %v1142_v16, %v723_v19 }
 0x16b   : > { %808 = vst [vmem:[%s539_s28] sm:$0xff] %v643_v17  ;;  %v1196_v21 = vpop.f32.mrf.mxu1 }
 0x16c   : > { %1521 = shalt.err (!%p1518_p7)
}
 0x16d   : > { %s1522_s28 = scalar_lea.hbm %s2105_s24, 128  ;;  %s1526_s11 = scalar_lea.hbm %s2330_s27, 1024 }
 0x16e   : > { %p1523_p8 = scmp.ne.s32.totalorder %s2105_s24, %s1522_s28  ;;  %p1527_p2 = scmp.lt.s32.totalorder %s2105_s24, %s2330_s27 }
 0x16f   : > { %p1528_p6 = scmp.lt.s32.totalorder %s1526_s11, %s1522_s28 }
 0x170   : > { %p1524_p9 = pnand %p1523_p8, %p2333_p0 }
 0x171   : > { %p1529_p4 = por %p1528_p6, %p1527_p2 }
 0x172   : > { %p1525_p10 = pneg %p1524_p9 }
 0x174   : > { %p1530_p3 = pnand %p1529_p4, %p1525_p10 }
 0x176   : > { %1533 = shalt.err (!%p1530_p3)
}
 0x177   : > { %1218 = dma.vmem_to_hbm [thread:$0]  (%p2333_p0), %s2107_s9, 128, %s2105_s24, %s812_s15   ;;  %809 = vst [vmem:[%s546_s4] sm:$0xff] %v724_v20 }
 0x178   : > { %s553_s6 = scalar_lea.vmem [#allocation14], %s2086_s26  ;;  %s484_s1 = scalar_lea.vmem [#allocation10], %s456_s29 }
 0x179   : > { %s2142_s12 = sshll.u32 %s553_s6, 4  ;;  %v1144_v22 = vld [vmem:[%s484_s1] ss:$0 sm:$0xff]  ;;  %s817_s19 = scalar_lea.sflag [#allocation13], %s2047_s7  ;;  %s868_s12 = int_to_ptr.vmem [resolvable:$true] %s2142_s12 }
 0x17a   : > { %s1534_s28 = scalar_lea.vmem %s2115_s13, 128  ;;  %s1728_s8 = smov [#allocation12]  }
 0x17b   : > { %p1535_p12 = scmp.ne.s32.totalorder %s2115_s13, %s1534_s28  ;;  %s1538_s17 = sshll.u32 %s1728_s8, 4  ;;  %s1539_s17 = int_to_ptr.vmem [resolvable:$false] %s1538_s17 }
 0x17c   : > { %s1540_s11 = scalar_lea.vmem %s1539_s17, 256  ;;  %p1541_p5 = scmp.lt.s32.totalorder %s2115_s13, %s1539_s17 }
 0x17d   : > { %p1536_p13 = pnand %p1535_p12, %p2333_p0  ;;  %p1542_p1 = scmp.lt.s32.totalorder %s1540_s11, %s1534_s28 }
 0x17f   : > { %p1537_p11 = pneg %p1536_p13  ;;  %p1543_p7 = por %p1542_p1, %p1541_p5 }
 0x181   : > { %p1544_p8 = pnand %p1543_p7, %p1537_p11 }
 0x183   : > { %1547 = shalt.err (!%p1544_p8)
}
 0x184   : > { %s1548_s23 = scalar_lea.hbm %s2113_s21, 128  ;;  %s1552_s4 = scalar_lea.hbm %s2332_s25, 1024 }
 0x185   : > { %p1549_p9 = scmp.ne.s32.totalorder %s2113_s21, %s1548_s23  ;;  %p1553_p6 = scmp.lt.s32.totalorder %s2113_s21, %s2332_s25 }
 0x186   : > { %p1554_p4 = scmp.lt.s32.totalorder %s1552_s4, %s1548_s23 }
 0x187   : > { %p1550_p10 = pnand %p1549_p9, %p2333_p0 }
 0x188   : > { %p1555_p3 = por %p1554_p4, %p1553_p6 }
 0x189   : > { %p1551_p2 = pneg %p1550_p10 }
 0x18b   : > { %p1556_p12 = pnand %p1555_p3, %p1551_p2 }
 0x18d   : > { %1559 = shalt.err (!%p1556_p12)
}
 0x18e   : > { %1219 = dma.vmem_to_hbm [thread:$0]  (%p2333_p0), %s2115_s13, 128, %s2113_s21, %s817_s19   ;;  %v804_v23 = vpop.f32.mrf.mxu0 }
 0x18f   : > { %v805_v24 = vadd.f32 %v1144_v22, %v804_v23  ;;  %s2334_s1 = sld [smem:[#allocation43_spill]]  ;;  %s1560_s8 = scalar_lea.vmem %s868_s12, 128 }
 0x190   : > { %v1207_v25 = vpop.f32.mrf.mxu0  ;;  %p1561_p13 = scmp.ne.s32.totalorder %s868_s12, %s1560_s8  ;;  %s1729_s17 = smov [#allocation14]  }
 0x191   : > { %810 = vst [vmem:[%s553_s6] sm:$0xff] %v805_v24  ;;  %s1564_s11 = sshll.u32 %s1729_s17, 4  ;;  %s1565_s11 = int_to_ptr.vmem [resolvable:$false] %s1564_s11 }
 0x192   : > { %p1562_p11 = pnand %p1561_p13, %p2333_p0  ;;  %s1566_s23 = scalar_lea.vmem %s1565_s11, 256 }
 0x193   : > { %p1567_p1 = scmp.lt.s32.totalorder %s868_s12, %s1565_s11  ;;  %p1568_p7 = scmp.lt.s32.totalorder %s1566_s23, %s1560_s8 }
 0x194   : > { %p1563_p5 = pneg %p1562_p11 }
 0x195   : > { %s865_s28 = scalar_lea.hbm %s2334_s1, %s2095_s3  ;;  %p1569_p8 = por %p1568_p7, %p1567_p1 }
 0x197   : > { %p1570_p9 = pnand %p1569_p8, %p1563_p5 }
 0x199   : > { %1573 = shalt.err (!%p1570_p9)
}
 0x19a   : > { %s1574_s13 = scalar_lea.hbm %s865_s28, 128  ;;  %s1578_s21 = scalar_lea.hbm %s2334_s1, 1024 }
 0x19b   : > { %p1575_p10 = scmp.ne.s32.totalorder %s865_s28, %s1574_s13  ;;  %p1579_p4 = scmp.lt.s32.totalorder %s865_s28, %s2334_s1 }
 0x19c   : > { %p1580_p3 = scmp.lt.s32.totalorder %s1578_s21, %s1574_s13 }
 0x19d   : > { %p1576_p2 = pnand %p1575_p10, %p2333_p0 }
 0x19e   : > { %p1581_p12 = por %p1580_p3, %p1579_p4 }
 0x19f   : > { %p1577_p6 = pneg %p1576_p2 }
 0x1a1   : > { %p1582_p13 = pnand %p1581_p12, %p1577_p6 }
 0x1a3   : > { %1585 = shalt.err (!%p1582_p13)
}
 0x1a4   : > { %1220 = dma.vmem_to_hbm [thread:$0]  (%p2333_p0), %s868_s12, 128, %s865_s28, %s817_s19  }
 0x1a5 PF: > { %s2335_s9 = sld [smem:[#allocation20_spill]]  ;;  %p1251_p11 = scmp.ge.s32.totalorder %s1716_s22, 2 }
 0x1a6   : > { %s2336_s4 = sld [smem:[#allocation34_spill]] }
 0x1ab   : > { %s879_s24 = sand.u32 1, %s2335_s9  }
 0x1ac   : > { %p2337_p5 = scmp.ne.s32.totalorder %s2336_s4, 0  ;;  %s880_s15 = scalar_lea.sflag [#allocation4], %s879_s24 }
 0x1ae   : > { %p1241_p1 = pnand %p1251_p11, %p2337_p5 }
 0x1b0   : > { %p1242_p7 = pneg %p1241_p1 }
 0x1b2   : > { %1655 = dma.done.wait (%p1242_p7), %s880_s15, 128  }
 0x1b3   : > { %1657 = vsyncadd (%p1242_p7), %s880_s15, 4294967168  ;;  %s2338_s5 = sadd.s32 4294967294, %s1716_s22  }
 0x1b4   : > { %s888_s30 = sand.u32 1, %s2338_s5  }
 0x1b5   : > { %s889_s8 = scalar_lea.sflag [#allocation13], %s888_s30 }
 0x1b6   : > { %1659 = dma.done.wait (%p1242_p7), %s889_s8, 256  }
 0x1b7   : > { %1661 = vsyncadd (%p1242_p7), %s889_s8, 4294967040  ;;  %s35_s22 = sadd.s32 1, %s1716_s22   ;;  %s2340_s7 = sld [smem:[#allocation21_spill]] }
 0x1b8   : > { %p2197_p0 = scmp.ge.s32.totalorder %s35_s22, 10   ;;  %s2341_s11 = sld [smem:[#allocation33_spill]] }
 0x1b9   : > { %s2342_s12 = sld [smem:[#allocation22_spill]]  ;;  %s2350_s30 = smov %s1668_s10 }
 0x1ba   : > { %s2343_s19 = sld [smem:[#allocation31_spill]]  ;;  %s2352_s13 = smov %s1684_s14 }
 0x1bb   : > { %s2344_s28 = sld [smem:[#allocation23_spill]]  ;;  %s2354_s15 = smov %s1692_s16 }
 0x1bc   : > { %s2345_s17 = sld [smem:[#allocation32_spill]]  ;;  %s2356_s18 = smov %s1708_s20 }
 0x1bd   : > { %s2346_s23 = sld [smem:[#allocation26_spill]]  ;;  %s2351_s10 = smov %s2340_s7 }
 0x1be   : > { %s2347_s26 = sld [smem:[#allocation28_spill]] }
 0x1bf   : > { %s2348_s21 = sld [smem:[#allocation29_spill]] }
 0x1c0   : > { %s2353_s14 = smov %s2343_s19  ;;  %34 = sbr.rel (!%p2197_p0) target bundleno = 26 (0x1a), region = 179 }
 0x1c1   : > { %s2355_s16 = smov %s2344_s28 }
 0x1c3   : > { %s2357_s19 = smov %s2346_s23 }
 0x1c4   : > { %s2358_s20 = smov %s2347_s26 }
 0x1c5   :  { %903 = vsyncpa [#allocation3], 1 }
 0x1c6   :  { %905 = vsyncpa [#allocation3 + $0x1], 1 }
 0x1c7   :  { %906 = vsyncpa [#allocation6], 1 }
 0x1c8   :  { %908 = vsyncpa [#allocation6 + $0x1], 1 }
 0x1c9   :  { %909 = vsyncpa [#allocation9], 1 }
 0x1ca   :  { %911 = vsyncpa [#allocation9 + $0x1], 1 }
 0x1cb   :  { %912 = vsyncpa [#allocation4], 1 }
 0x1cc   :  { %914 = vsyncpa [#allocation4 + $0x1], 1 }
 0x1cd   :  { %915 = vsyncpa [#allocation13], 1 }
 0x1ce   :  { %917 = vsyncpa [#allocation13 + $0x1], 1 }

</bundles_post_ra>
